<compile_context>
chip_gen: v6e
topology: v6e:2x2x1
jax: 0.10.0
libtpu: 0.0.40
codegen_flags: <defaults>
</compile_context>

<pallas_src>
import functools
import math

import jax
import jax.numpy as jnp
from jax.experimental import pallas as pl
from jax.experimental.pallas import tpu as pltpu


def _add_pe_kernel(x_ref, pe_ref, o_ref):
    # x_ref/o_ref: (B, chunk); pe_ref: (1, chunk). Pure VPU add, f32 accumulate,
    # single cast at the store. PE broadcasts over the sublane (batch) dim.
    o_ref[...] = (x_ref[...].astype(jnp.float32) + pe_ref[...]).astype(o_ref.dtype)
    # TODO(synk): dropout with p > 0 would need pltpu.prng_seed / prng_random_bits;
    # the module uses p = 0, which is the identity.


@functools.lru_cache(maxsize=None)
def _build_pe(seq_len, d_model):
    """Sinusoidal PE, identical to the PyTorch registered buffer pe[0, :seq_len, :]."""
    assert d_model % 2 == 0, "PyTorch slicing construction requires even d_model"
    position = jnp.arange(seq_len, dtype=jnp.float32)[:, None]            # (S, 1)
    div_term = jnp.exp(
        jnp.arange(0, d_model, 2, dtype=jnp.float32) * (-math.log(10000.0) / d_model)
    )                                                                     # (D/2,)
    angles = position * div_term                                          # (S, D/2)
    pe = jnp.zeros((seq_len, d_model), dtype=jnp.float32)
    pe = pe.at[:, 0::2].set(jnp.sin(angles))
    pe = pe.at[:, 1::2].set(jnp.cos(angles))
    return pe


def _vmem_capacity_bytes():
    """Physical VMEM of the current TPU generation; conservative default on failure."""
    try:
        return int(pltpu.get_tpu_info().vmem_capacity_bytes)
    except Exception:
        return 64 * 1024 * 1024  # assume v7x-class (smallest VMEM) if query fails


def _pick_chunk(n, batch, itemsize, block_cap_bytes):
    """Lane chunk: multiple of 128, (batch, chunk) block <= block_cap_bytes."""
    if n <= 128:
        return n  # single full-extent block (exempt from the (8,128) rule)
    n_up = pl.cdiv(n, 128) * 128
    max_lanes = max(128, block_cap_bytes // max(1, batch * itemsize))
    chunk = max(128, (max_lanes // 128) * 128)
    chunk = min(chunk, n_up)
    # Ensure >= 2 grid steps when there is enough work so the "parallel" axis
    # shards across both v7x TensorCores (no-op cost on single-TC v5e/v6e).
    if pl.cdiv(n, chunk) == 1 and chunk >= 256:
        chunk = max(128, ((chunk // 2) // 128) * 128)
    return chunk


def positional_encoding(x):
    """x: (B, S, D). Returns dropout_{p=0}(x + PE[:, :S]) == x + PE[:S]."""
    B, S, D = x.shape
    pe = _build_pe(S, D)                                   # (S, D) f32 buffer (cached)

    n = S * D
    x2 = x.reshape(B, n)                                   # lane-dense layout
    pe2 = pe.reshape(1, n)
    itemsize = jnp.dtype(x.dtype).itemsize

    vmem_cap = _vmem_capacity_bytes()
    if vmem_cap <= 64 * 1024 * 1024:        # v7x-class: 64 MiB physical VMEM
        block_cap = 4 * 1024 * 1024
        vmem_limit = 48 * 1024 * 1024
    else:                                    # v5e / v6e: 128 MiB physical VMEM
        block_cap = 8 * 1024 * 1024
        vmem_limit = 64 * 1024 * 1024

    chunk = _pick_chunk(n, B, itemsize, block_cap)
    grid = (pl.cdiv(n, chunk),)

    cost = pl.CostEstimate(
        flops=B * n,
        transcendentals=0,
        bytes_accessed=2 * B * n * itemsize + n * 4,       # read x + pe, write out
    )

    out2 = pl.pallas_call(
        _add_pe_kernel,
        out_shape=jax.ShapeDtypeStruct((B, n), x.dtype),
        grid_spec=pltpu.PrefetchScalarGridSpec(
            num_scalar_prefetch=0,
            grid=grid,
            in_specs=[
                pl.BlockSpec((B, chunk), lambda c: (0, c)),   # x (lane-dense)
                pl.BlockSpec((1, chunk), lambda c: (0, c)),   # pe (batch-independent)
            ],
            out_specs=pl.BlockSpec((B, chunk), lambda c: (0, c)),
        ),
        compiler_params=pltpu.CompilerParams(
            dimension_semantics=("parallel",),
            # Double-buffered x/out/pe blocks stay well below these limits on
            # every generation (blocks are capped at 4-8 MiB above).
            vmem_limit_bytes=vmem_limit,
        ),
        cost_estimate=cost,
        input_output_aliases={0: 0},        # donate x2's HBM buffer to the output
    )(x2, pe2)
    return out2.reshape(B, S, D)


def _reference(x):
    # Pure-JAX reference mirroring the PyTorch forward: x + pe[:, :S] (dropout p=0).
    B, S, D = x.shape
    return (x.astype(jnp.float32) + _build_pe(S, D)[None, :, :]).astype(x.dtype)


if __name__ == "__main__":
    # Shapes consistent with `PositionalEncoding(20, 0)`: d_model=20, dropout=0.
    B, S, D = 2, 8, 20
    key = jax.random.PRNGKey(0)
    x = jax.random.normal(key, (B, S, D), dtype=jnp.float32)

    out = jax.block_until_ready(positional_encoding(x))
    ref = _reference(x)
    assert out.shape == (B, S, D)
    assert jnp.allclose(out, ref, atol=1e-5, rtol=1e-5)

    # Larger shape exercises the lane-dense chunked path with >= 2 grid steps.
    B2, S2, D2 = 32, 512, 128
    x_big = jax.random.normal(jax.random.PRNGKey(1), (B2, S2, D2), dtype=jnp.float32)
    out_big = jax.block_until_ready(positional_encoding(x_big))
    assert jnp.allclose(out_big, _reference(x_big), atol=1e-5, rtol=1e-5)

    # Ragged tail: S*D not a multiple of 128 (exercises the masked last block).
    B3, S3, D3 = 4, 100, 20
    x_rag = jax.random.normal(jax.random.PRNGKey(2), (B3, S3, D3), dtype=jnp.float32)
    out_rag = jax.block_until_ready(positional_encoding(x_rag))
    assert jnp.allclose(out_rag, _reference(x_rag), atol=1e-5, rtol=1e-5)

    print("KERNEL_OK")
</pallas_src>

<mosaic_0001>
module attributes {stable_mosaic.version = 11 : i64} {
  func.func @_add_pe_kernel(%arg0: i32, %arg1: memref<2x128xf32, #tpu.memory_space<vmem>>, %arg2: memref<1x128xf32, #tpu.memory_space<vmem>>, %arg3: memref<2x128xf32, #tpu.memory_space<vmem>>) attributes {dimension_semantics = [#tpu.dimension_semantics<parallel>], iteration_bounds = array<i64: 2>, scalar_prefetch = 0 : i64, scratch_operands = 0 : i64, tpu.core_type = #tpu.core_type<tc>, window_params = [{transform_indices = @transform_0, window_bounds = array<i64: 2, 128>}, {transform_indices = @transform_1, window_bounds = array<i64: 1, 128>}, {transform_indices = @transform_2, window_bounds = array<i64: 2, 128>}]} {
    %c0 = arith.constant 0 : index
    %c0_0 = arith.constant 0 : index
    %0 = vector.load %arg1[%c0, %c0_0] : memref<2x128xf32, #tpu.memory_space<vmem>>, vector<2x128xf32>
    %c0_1 = arith.constant 0 : index
    %c0_2 = arith.constant 0 : index
    %1 = vector.load %arg2[%c0_1, %c0_2] : memref<1x128xf32, #tpu.memory_space<vmem>>, vector<1x128xf32>
    %2 = vector.broadcast %1 : vector<1x128xf32> to vector<2x128xf32>
    %3 = arith.addf %0, %2 : vector<2x128xf32>
    %c0_3 = arith.constant 0 : index
    %c0_4 = arith.constant 0 : index
    %4 = vector.load %arg3[%c0_3, %c0_4] : memref<2x128xf32, #tpu.memory_space<vmem>>, vector<2x128xf32>
    tpu.vector_store %arg3[%c0_3, %c0_4], %3 {strides = array<i32>} : memref<2x128xf32, #tpu.memory_space<vmem>>, vector<2x128xf32>,
    return
  }
  func.func @transform_0(%arg0: i32) -> (i32, i32) {
    %c0_i32 = arith.constant 0 : i32
    %c0_i32_0 = arith.constant 0 : i32
    return %c0_i32, %arg0 : i32, i32
  }
  func.func @transform_1(%arg0: i32) -> (i32, i32) {
    %c0_i32 = arith.constant 0 : i32
    %c0_i32_0 = arith.constant 0 : i32
    return %c0_i32, %arg0 : i32, i32
  }
  func.func @transform_2(%arg0: i32) -> (i32, i32) {
    %c0_i32 = arith.constant 0 : i32
    %c0_i32_0 = arith.constant 0 : i32
    return %c0_i32, %arg0 : i32, i32
  }
}

</mosaic_0001>

<bundles_post_ra>
// kernel: tpu_custom_call.1
= control target key start
LH: loop header
LB: loop body
LE: loop exit
PB: predicated region body
PF: predicated region fallthrough
CT: control target
= control target key end

     0   :  { %7 = vsyncpa [#allocation3], 0  ;;  %s592_s0 = inlined_call_operand.hbm [shape: f32[2,160], index: 0, kind: input, shape index: {}, may-alias: {0,2}]   ;;  %s593_s1 = inlined_call_operand.vmem [shape: f32[1,160], index: 1, kind: input, shape index: {}]   ;;  %s594_s2 = inlined_call_operand.hbm [shape: f32[2,160], index: 2, kind: output, shape index: {}, may-alias: {0,2}]  }
   0x1   :  { %9 = vsyncpa [#allocation3 + $0x1], 0 }
   0x2   :  { %10 = vsyncpa [#allocation4], 0 }
   0x3   :  { %12 = vsyncpa [#allocation4 + $0x1], 0  ;;  %s446_s9 = smov 0   ;;  %s448_s10 = smov 0  }
   0x4   :  { %s450_s11 = smov 0   ;;  %s452_s12 = smov 0  }
   0x5 LB: > { %s467_s13 = sadd.s32 4294967295, %s427_s12   ;;  %s276_s14 = sadd.s32 4294967294, %s427_s12   ;;  %s427_s12 = sphi %s452_s12, %s611_s12   ;;  %s423_s11 = sphi %s450_s11, %s610_s11   ;;  %s419_s10 = sphi %s448_s10, %s609_s10   ;;  %s415_s9 = sphi %s446_s9, %s608_s9  }
   0x6   : > { %s471_s15 = sadd.s32 1, %s427_s12   ;;  %s25_s16 = sadd.s32 1, %s423_s11 }
   0x7   : > { %s22_s17 = ssub.s32 %s427_s12, %s471_s15  ;;  %p32_p0 = scmp.ne.s32.totalorder %s423_s11, %s419_s10 }
   0x8   : > { %p23_p1 = scmp.eq.s32.totalorder %s22_s17, 0  ;;  %p33_p2 = scmp.eq.s32.totalorder %s427_s12, 0 }
   0x9   : > { %p38_p3 = scmp.ne.s32.totalorder %s419_s10, %s415_s9  ;;  %p39_p4 = scmp.eq.s32.totalorder %s467_s13, 0 }
   0xa   : > { %s483_s18 = scalar_select %p23_p1, %s423_s11, %s25_s16  }
   0xb   : > { %p485_p5 = por %p33_p2, %p32_p0  ;;  %p489_p6 = por %p39_p4, %p38_p3 }
   0xc   : > { %p88_p7 = scmp.eq.s32.totalorder %s467_s13, 1  ;;  %p94_p8 = scmp.eq.s32.totalorder %s276_s14, 1 }
   0xd   : > { %s598_s20 = scalar_select %p489_p6, 1, 0 }
   0xe   : > { %p301_p10 = scmp.lt.s32.totalorder %s427_s12, 2  ;;  %p496_p11 = por %p88_p7, %p32_p0 }
   0xf   : > { %p500_p12 = por %p94_p8, %p38_p3  ;;  %s114_s23 = sand.u32 1, %s423_s11  }
  0x10   : > { %s599_s21 = scalar_select %p496_p11, 1, 0 }
  0x11   : > { %s600_s22 = scalar_select %p500_p12, 1, 0 }
  0x12   : > { %s280_s24 = sshll.u32 %s427_s12, 5  ;;  %s279_s25 = sshll.u32 %s114_s23, 1 }
  0x13   : > { %s509_s28 = scalar_lea.hbm %s592_s0, %s280_s24  ;;  %s118_s29 = scalar_lea.vmem [#allocation2], %s279_s25 }
  0x14   : > { %s125_s30 = sshll.u32 %s118_s29, 4  ;;  %p513_p13 = pnand %p301_p10, %p485_p5  ;;  %s517_s30 = int_to_ptr.vmem [resolvable:$true] %s125_s30 }
  0x15   : > { %s115_s4 = scalar_lea.sflag [#allocation3], %s114_s23  ;;  %s335_s5 = scalar_lea.hbm %s509_s28, 32 }
  0x16   : > { %p336_p2 = scmp.ne.s32.totalorder %s509_s28, %s335_s5  ;;  %p337_p3 = pneg %p513_p13 }
  0x17   : > { %s340_s8 = scalar_lea.hbm %s592_s0, 64  ;;  %p341_p5 = scmp.lt.s32.totalorder %s509_s28, %s592_s0 }
  0x18   : > { %p338_p4 = pnand %p337_p3, %p336_p2  ;;  %p342_p8 = scmp.lt.s32.totalorder %s340_s8, %s335_s5 }
  0x1a   : > { %p339_p7 = pneg %p338_p4  ;;  %p343_p10 = por %p342_p8, %p341_p5 }
  0x1c   : > { %p344_p9 = pnand %p343_p10, %p339_p7 }
  0x1e   : > { %347 = shalt.err (!%p344_p9)
}
  0x1f   : > { %s348_s17 = scalar_lea.vmem %s517_s30, 32  ;;  %s429_s19 = smov [#allocation2]  }
  0x20   : > { %p349_p0 = scmp.ne.s32.totalorder %s517_s30, %s348_s17  ;;  %s353_s23 = sshll.u32 %s429_s19, 4  ;;  %s354_s23 = int_to_ptr.vmem [resolvable:$false] %s353_s23 }
  0x21   : > { %s355_s24 = scalar_lea.vmem %s354_s23, 64  ;;  %p356_p4 = scmp.lt.s32.totalorder %s517_s30, %s354_s23 }
  0x22   : > { %p351_p1 = pnand %p349_p0, %p337_p3  ;;  %p357_p12 = scmp.lt.s32.totalorder %s355_s24, %s348_s17 }
  0x24   : > { %p352_p2 = pneg %p351_p1  ;;  %p358_p11 = por %p357_p12, %p356_p4 }
  0x26   : > { %p359_p6 = pnand %p358_p11, %p352_p2 }
  0x28   : > { %362 = shalt.err (!%p359_p6)
}
  0x29   : > { %296 = dma.hbm_to_vmem [thread:$0]  (!%p513_p13), %s509_s28, 32, %s517_s30, %s115_s4  }
  0x2a   : > { %p602_p9 = scmp.lt.s32.totalorder %s427_s12, 3  ;;  %p603_p7 = scmp.ge.s32.totalorder %s427_s12, 1 }
  0x2c   : > { %p137_p0 = pnand %p603_p7, %p602_p9 }
  0x2d   : > { %s544_s25 = sand.u32 (!%p137_p0), 1, %s419_s10   ;;  %p604_p6 = scmp.ne.s32.totalorder (!%p137_p0), %s598_s20, 0 }
  0x2e   : > { %140 = sbr.rel (%p137_p0) target bundleno = 79 (0x4f), region = 28  ;;  %s282_s26 = sshll.u32 (!%p137_p0), %s544_s25, 1 }
  0x2f   : > { %s143_s27 = scalar_lea.sflag (!%p137_p0), [#allocation3], %s544_s25  ;;  %s146_s29 = scalar_lea.vmem (!%p137_p0), [#allocation2], %s282_s26 }
  0x33   : > { %406 = dma.done.wait (%p604_p6), %s143_s27, 32  }
  0x34   : > { %408 = vsyncadd (%p604_p6), %s143_s27, 4294967264  ;;  %p170_p11 = scmp.lt.s32.totalorder %s467_s13, 1  ;;  %s169_s5 = scalar_lea.vmem [#allocation5], %s282_s26  ;;  %v173_v0 = vld [vmem:[%s146_s29] sm:$0x3] }
  0x35   : > { %s197_s6 = sshll.u32 %s169_s5, 4  ;;  %s286_s7 = sshll.u32 %s467_s13, 5  ;;  %s198_s6 = int_to_ptr.vmem [resolvable:$true] %s197_s6 }
  0x36   : > { %s171_s28 = scalar_select %p170_p11, %s467_s13, 1 }
  0x37   : > { %s195_s14 = scalar_lea.hbm %s594_s2, %s286_s7  ;;  %s184_s16 = scalar_lea.sflag [#allocation4], %s544_s25 }
  0x38   : > { %s172_s4 = scalar_lea.vmem %s593_s1, %s171_s28  ;;  %s363_s17 = scalar_lea.vmem %s198_s6, 32 }
  0x39   : > { %v284_v1 = vld [vmem:[%s172_s4] ss:$0 sm:$0xff]  ;;  %p364_p12 = scmp.ne.s32.totalorder %s198_s6, %s363_s17  ;;  %p605_p13 = scmp.ne.s32.totalorder %s599_s21, 0 }
  0x3a   : > { %v181_v2 = vadd.f32 %v284_v1, %v173_v0  ;;  %s430_s19 = smov [#allocation5]  }
  0x3b   : > { %p365_p1 = pnand %p364_p12, %p605_p13  ;;  %s367_s23 = sshll.u32 %s430_s19, 4  ;;  %s368_s23 = int_to_ptr.vmem [resolvable:$false] %s367_s23 }
  0x3c   : > { %182 = vst [vmem:[%s169_s5] sm:$0x3] %v181_v2  ;;  %s369_s24 = scalar_lea.vmem %s368_s23, 64  ;;  %p370_p5 = scmp.lt.s32.totalorder %s198_s6, %s368_s23 }
  0x3d   : > { %p366_p3 = pneg %p365_p1  ;;  %p371_p8 = scmp.lt.s32.totalorder %s369_s24, %s363_s17 }
  0x3f   : > { %p372_p10 = por %p371_p8, %p370_p5 }
  0x41   : > { %p373_p2 = pnand %p372_p10, %p366_p3 }
  0x43   : > { %376 = shalt.err (!%p373_p2)
}
  0x44   : > { %s377_s13 = scalar_lea.hbm %s195_s14, 32  ;;  %s381_s27 = scalar_lea.hbm %s594_s2, 64 }
  0x45   : > { %p378_p4 = scmp.ne.s32.totalorder %s195_s14, %s377_s13  ;;  %p382_p0 = scmp.lt.s32.totalorder %s195_s14, %s594_s2 }
  0x46   : > { %p383_p6 = scmp.lt.s32.totalorder %s381_s27, %s377_s13 }
  0x47   : > { %p379_p9 = pnand %p378_p4, %p605_p13 }
  0x48   : > { %p384_p11 = por %p383_p6, %p382_p0 }
  0x49   : > { %p380_p7 = pneg %p379_p9 }
  0x4b   : > { %p385_p12 = pnand %p384_p11, %p380_p7 }
  0x4d   : > { %388 = shalt.err (!%p385_p12)
}
  0x4e   : > { %291 = dma.vmem_to_hbm [thread:$0]  (%p605_p13), %s198_s6, 32, %s195_s14, %s184_s16  }
  0x4f PF: > { %s209_s30 = sand.u32 1, %s415_s9   ;;  %p606_p1 = scmp.ne.s32.totalorder %s600_s22, 0 }
  0x50   : > { %p607_p3 = scmp.ge.s32.totalorder %s427_s12, 2  ;;  %s210_s3 = scalar_lea.sflag [#allocation4], %s209_s30 }
  0x52   : > { %p298_p5 = pnand %p607_p3, %p606_p1 }
  0x54   : > { %p299_p8 = pneg %p298_p5 }
  0x56   : > { %410 = dma.done.wait (%p299_p8), %s210_s3, 32  }
  0x57   : > { %412 = vsyncadd (%p299_p8), %s210_s3, 4294967264  ;;  %p15_p10 = scmp.ge.s32.totalorder %s471_s15, 4   ;;  %s608_s9 = smov %s419_s10 }
  0x58   : > { %s609_s10 = smov %s423_s11  ;;  %s610_s11 = smov %s483_s18 }
  0x59   : > { %s611_s12 = smov %s471_s15  ;;  %17 = sbr.rel (!%p15_p10) target bundleno = 5 (0x5), region = 76 }
  0x5e   :  { %215 = vsyncpa [#allocation3], 1 }
  0x5f   :  { %217 = vsyncpa [#allocation3 + $0x1], 1 }
  0x60   :  { %218 = vsyncpa [#allocation4], 1 }
  0x61   :  { %220 = vsyncpa [#allocation4 + $0x1], 1 }

</bundles_post_ra>
